<compile_context>
chip_gen: v6e
topology: v6e:2x2x1
jax: 0.10.0
libtpu: 0.0.40
codegen_flags: <defaults>
</compile_context>

<pallas_src>
import functools

import jax
import jax.numpy as jnp
from jax.experimental import pallas as pl
from jax.experimental.pallas import tpu as pltpu


def _round_up(x: int, m: int) -> int:
    return (x + m - 1) // m * m


def _pad_to(x, target_shape):
    pads = [(0, t - s) for s, t in zip(x.shape, target_shape)]
    if any(p for _, p in pads):
        x = jnp.pad(x, pads)
    return x


def _gcn_kernel(text_ref, adj_ref, w_ref, b_ref, out_ref, acc_ref, dsum_ref,
                *, approx_recip: bool):
    """One grid step.

    text_ref: (BB, TK, FinP)   adj_ref: (BB, TM, TK)
    w_ref:    (FinP, FoutP)    b_ref:   (1, FoutP)
    out_ref:  (BB, TM, FoutP)
    acc_ref:  (BB, TM, FinP) f32 scratch -- running sum_k adj[:, :, kblk] @ text[:, kblk, :]
    dsum_ref: (BB, TM, 1)    f32 scratch -- running adjacency row-sum (denominator)
    Grid: (B // BB, NrP // TM, NcP // TK); reduction (K) axis is last.
    """
    k = pl.program_id(2)
    bb = adj_ref.shape[0]  # small static constant (1, or B when folded)

    @pl.when(k == 0)
    def _init():
        acc_ref[...] = jnp.zeros_like(acc_ref)
        dsum_ref[...] = jnp.zeros_like(dsum_ref)

    # Accumulate adj @ text (MXU) and the adjacency row-sums (XLU) per K tile.
    for b in range(bb):
        adj_b = adj_ref[b].astype(jnp.float32)                       # (TM, TK)
        acc_ref[b] += jnp.dot(adj_b, text_ref[b].astype(jnp.float32),
                              preferred_element_type=jnp.float32)    # (TM, FinP)
        dsum_ref[b] += jnp.sum(adj_b, axis=1, keepdims=True)         # (TM, 1)

    @pl.when(k == pl.num_programs(2) - 1)
    def _finalize():
        w = w_ref[...].astype(jnp.float32)        # (FinP, FoutP), loaded once
        bias = b_ref[...].astype(jnp.float32)     # (1, FoutP)
        for b in range(bb):
            # (adj @ text) @ W  ==  adj @ (text @ W)
            agg = jnp.dot(acc_ref[b], w, preferred_element_type=jnp.float32)
            denom = dsum_ref[b] + 1.0             # (TM, 1), always >= 1
            inv = pl.reciprocal(denom, approx=approx_recip)
            out_ref[b] = (agg * inv + bias).astype(out_ref.dtype)


def graph_convolution(text, adj, weight, bias=None, *,
                      tile_rows: int = 256, tile_cols: int = 512,
                      approx_recip: bool = False):
    """text: (B, N, Fin), adj: (B, N, N), weight: (Fin, Fout), bias: (Fout,)."""
    B, N, Fin = text.shape
    Fin_w, Fout = weight.shape
    assert Fin_w == Fin
    assert adj.shape == (B, N, N)
    if bias is None:
        bias = jnp.zeros((Fout,), dtype=weight.dtype)

    # Lane-dense feature padding (zero-pad weight/bias columns, slice result).
    FinP = _round_up(Fin, 128)
    FoutP = _round_up(Fout, 128)

    # Row (output) tile and padded extent.
    TM = tile_rows if N > tile_rows else _round_up(N, 8)
    NrP = _round_up(N, TM)
    # Column (reduction) tile and padded extent (lane axis of adj).
    if N > tile_cols:
        TK = tile_cols                  # multiple of 128
        NcP = _round_up(N, TK)
    else:
        NcP = _round_up(N, 8)
        TK = NcP                        # block == full array dim is allowed

    # Fold several batches into one grid step when one (TM, TK) tile already
    # covers the whole graph (amortizes per-step pipeline overhead).
    tile_elems = TM * TK + TK * FinP + TM * FoutP + TM * FinP
    if NrP == TM and NcP == TK and B <= 8 and B * tile_elems * 4 <= (8 << 20):
        BB = B
    else:
        BB = 1

    grid = (B // BB, NrP // TM, NcP // TK)

    # Zero padding is neutral for matmul, row-sum and the bias add.
    text_p = _pad_to(text, (B, NcP, FinP))
    adj_p = _pad_to(adj, (B, NrP, NcP))
    w_p = _pad_to(weight, (FinP, FoutP))
    b_p = _pad_to(bias.reshape(1, Fout), (1, FoutP))

    def _isz(a):
        return jnp.dtype(a.dtype).itemsize

    # Actual resident VMEM footprint: double-buffered streamed tiles, the
    # grid-invariant weight/bias (constant index_map -> DMA'd once) and the
    # f32 scratch.  >= 32 MiB so the scoped default (16 MiB on v5e, 32 MiB on
    # v6e/v7x) never caps tile size; <= 64 MiB so defaults fit v7x's 64 MiB
    # physical VMEM (v5e/v6e have 128 MiB).
    resident = (2 * BB * TM * TK * _isz(adj_p)
                + 2 * BB * TK * FinP * _isz(text_p)
                + 2 * BB * TM * FoutP * _isz(text_p)
                + 2 * FinP * FoutP * _isz(w_p)
                + 2 * FoutP * _isz(b_p)
                + BB * TM * FinP * 4          # accumulator scratch
                + BB * TM * 128 * 4)          # row-sum scratch (lane padded)
    vmem_limit = int(min(max(resident * 3 // 2, 32 << 20), 64 << 20))

    flops = 2.0 * B * N * N * Fin + 2.0 * B * N * Fin * Fout
    bytes_accessed = (text_p.size * _isz(text_p) + adj_p.size * _isz(adj_p)
                      + w_p.size * _isz(w_p) + b_p.size * _isz(b_p)
                      + B * NrP * FoutP * _isz(text_p))
    cost = pl.CostEstimate(flops=int(flops), transcendentals=0,
                           bytes_accessed=int(bytes_accessed))

    kernel = functools.partial(_gcn_kernel, approx_recip=approx_recip)

    out_p = pl.pallas_call(
        kernel,
        out_shape=jax.ShapeDtypeStruct((B, NrP, FoutP), text.dtype),
        grid_spec=pltpu.PrefetchScalarGridSpec(
            num_scalar_prefetch=0,
            grid=grid,
            in_specs=[
                # text rows follow the K (adj-column) axis.
                pl.BlockSpec((BB, TK, FinP), lambda b, i, k: (b, k, 0)),
                pl.BlockSpec((BB, TM, TK), lambda b, i, k: (b, i, k)),
                # Grid-invariant weight/bias: constant index_map => fetched once.
                pl.BlockSpec((FinP, FoutP), lambda b, i, k: (0, 0)),
                pl.BlockSpec((1, FoutP), lambda b, i, k: (0, 0)),
            ],
            out_specs=pl.BlockSpec((BB, TM, FoutP), lambda b, i, k: (b, i, 0)),
            scratch_shapes=[
                pltpu.VMEM((BB, TM, FinP), jnp.float32),
                pltpu.VMEM((BB, TM, 1), jnp.float32),
            ],
        ),
        compiler_params=pltpu.CompilerParams(
            dimension_semantics=("parallel", "parallel", "arbitrary"),
            vmem_limit_bytes=vmem_limit,
        ),
        cost_estimate=cost,
    )(text_p, adj_p, w_p, b_p)

    return out_p[:, :N, :Fout]


def _reference(text, adj, weight, bias):
    hidden = jnp.einsum("bni,io->bno", text, weight)
    denom = jnp.sum(adj, axis=2, keepdims=True) + 1.0
    out = jnp.einsum("bnm,bmo->bno", adj, hidden) / denom
    return out + bias


if __name__ == "__main__":
    # --- Test 1: small shapes matching the module's intended use ------------
    B, N, Fin, Fout = 2, 16, 32, 32
    k1, k2, k3, k4 = jax.random.split(jax.random.PRNGKey(0), 4)
    text = jax.random.normal(k1, (B, N, Fin), dtype=jnp.float32)
    adj = jax.random.uniform(k2, (B, N, N), dtype=jnp.float32)
    weight = jax.random.normal(k3, (Fin, Fout), dtype=jnp.float32) * 0.1
    bias = jax.random.normal(k4, (Fout,), dtype=jnp.float32) * 0.1

    out = jax.block_until_ready(graph_convolution(text, adj, weight, bias))
    ref = _reference(text, adj, weight, bias)
    assert out.shape == (B, N, Fout)
    assert jnp.allclose(out, ref, atol=1e-4, rtol=1e-4), "test-1 mismatch vs reference"

    # --- Test 2: exercises N/K tiling, accumulation and padding -------------
    B2, N2, Fin2, Fout2 = 1, 200, 48, 80
    k5, k6, k7, k8 = jax.random.split(jax.random.PRNGKey(1), 4)
    text2 = jax.random.normal(k5, (B2, N2, Fin2), dtype=jnp.float32)
    adj2 = jax.random.uniform(k6, (B2, N2, N2), dtype=jnp.float32)
    weight2 = jax.random.normal(k7, (Fin2, Fout2), dtype=jnp.float32) * 0.1
    bias2 = jax.random.normal(k8, (Fout2,), dtype=jnp.float32) * 0.1

    out2 = jax.block_until_ready(
        graph_convolution(text2, adj2, weight2, bias2, tile_rows=128, tile_cols=128))
    ref2 = _reference(text2, adj2, weight2, bias2)
    assert out2.shape == (B2, N2, Fout2)
    assert jnp.allclose(out2, ref2, atol=1e-3, rtol=1e-3), "test-2 mismatch vs reference"

    print("KERNEL_OK")
</pallas_src>

<mosaic_0001>
module attributes {stable_mosaic.version = 11 : i64} {
  func.func @_gcn_kernel(%arg0: i32, %arg1: i32, %arg2: i32, %arg3: memref<2x16x128xf32, #tpu.memory_space<vmem>>, %arg4: memref<2x16x16xf32, #tpu.memory_space<vmem>>, %arg5: memref<128x128xf32, #tpu.memory_space<vmem>>, %arg6: memref<1x128xf32, #tpu.memory_space<vmem>>, %arg7: memref<2x16x128xf32, #tpu.memory_space<vmem>>, %arg8: memref<2x16x128xf32, #tpu.memory_space<vmem>>, %arg9: memref<2x16x1xf32, #tpu.memory_space<vmem>>) attributes {dimension_semantics = [#tpu.dimension_semantics<parallel>, #tpu.dimension_semantics<parallel>, #tpu.dimension_semantics<arbitrary>], iteration_bounds = array<i64: 1, 1, 1>, scalar_prefetch = 0 : i64, scratch_operands = 2 : i64, tpu.core_type = #tpu.core_type<tc>, window_params = [{transform_indices = @transform_0, window_bounds = array<i64: 2, 16, 128>}, {transform_indices = @transform_1, window_bounds = array<i64: 2, 16, 16>}, {pipeline_mode = #tpu.pipeline_mode<synchronous>, transform_indices = @transform_2, window_bounds = array<i64: 128, 128>}, {pipeline_mode = #tpu.pipeline_mode<synchronous>, transform_indices = @transform_3, window_bounds = array<i64: 1, 128>}, {transform_indices = @transform_4, window_bounds = array<i64: 2, 16, 128>}]} {
    %c0_i32 = arith.constant 0 : i32
    %0 = arith.cmpi eq, %arg2, %c0_i32 : i32
    %1 = arith.extui %0 : i1 to i32
    %c0_i32_0 = arith.constant 0 : i32
    %2 = arith.cmpi ne, %1, %c0_i32_0 : i32
    scf.if %2 {
      %cst_40 = arith.constant 0.000000e+00 : f32
      %44 = vector.broadcast %cst_40 : f32 to vector<2x16x128xf32>
      %c0_41 = arith.constant 0 : index
      %c0_42 = arith.constant 0 : index
      %c0_43 = arith.constant 0 : index
      %45 = vector.load %arg8[%c0_41, %c0_42, %c0_43] : memref<2x16x128xf32, #tpu.memory_space<vmem>>, vector<2x16x128xf32>
      tpu.vector_store %arg8[%c0_41, %c0_42, %c0_43], %44 {strides = array<i32>} : memref<2x16x128xf32, #tpu.memory_space<vmem>>, vector<2x16x128xf32>,
      %cst_44 = arith.constant 0.000000e+00 : f32
      %46 = vector.broadcast %cst_44 : f32 to vector<2x16x1xf32>
      %c0_45 = arith.constant 0 : index
      %c0_46 = arith.constant 0 : index
      %c0_47 = arith.constant 0 : index
      %47 = vector.load %arg9[%c0_45, %c0_46, %c0_47] : memref<2x16x1xf32, #tpu.memory_space<vmem>>, vector<2x16x1xf32>
      tpu.vector_store %arg9[%c0_45, %c0_46, %c0_47], %46 {strides = array<i32>} : memref<2x16x1xf32, #tpu.memory_space<vmem>>, vector<2x16x1xf32>,
    } else {
    }
    %c0 = arith.constant 0 : index
    %c0_1 = arith.constant 0 : index
    %c0_2 = arith.constant 0 : index
    %3 = vector.load %arg4[%c0, %c0_1, %c0_2] : memref<2x16x16xf32, #tpu.memory_space<vmem>>, vector<1x16x16xf32>
    %4 = vector.shape_cast %3 : vector<1x16x16xf32> to vector<16x16xf32>
    %c0_3 = arith.constant 0 : index
    %c0_4 = arith.constant 0 : index
    %c0_5 = arith.constant 0 : index
    %5 = vector.load %arg8[%c0_3, %c0_4, %c0_5] : memref<2x16x128xf32, #tpu.memory_space<vmem>>, vector<1x16x128xf32>
    %6 = vector.shape_cast %5 : vector<1x16x128xf32> to vector<16x128xf32>
    %c0_6 = arith.constant 0 : index
    %c0_7 = arith.constant 0 : index
    %c0_8 = arith.constant 0 : index
    %7 = vector.load %arg3[%c0_6, %c0_7, %c0_8] : memref<2x16x128xf32, #tpu.memory_space<vmem>>, vector<1x16x128xf32>
    %8 = vector.shape_cast %7 : vector<1x16x128xf32> to vector<16x128xf32>
    %cst = arith.constant dense<0.000000e+00> : vector<16x128xf32>
    %9 = tpu.matmul %4, %8, %cst {dimension_numbers = #tpu.dot_dimension_numbers<[1], [0], [0], [1], [0, 0, 1, 1], [], []>} : vector<16x16xf32>, vector<16x128xf32>, vector<16x128xf32> -> vector<16x128xf32>
    %10 = arith.addf %6, %9 : vector<16x128xf32>
    %c0_9 = arith.constant 0 : index
    %c0_10 = arith.constant 0 : index
    %c0_11 = arith.constant 0 : index
    %11 = vector.load %arg8[%c0_9, %c0_10, %c0_11] : memref<2x16x128xf32, #tpu.memory_space<vmem>>, vector<1x16x128xf32>
    %12 = vector.shape_cast %11 : vector<1x16x128xf32> to vector<16x128xf32>
    %13 = vector.shape_cast %10 : vector<16x128xf32> to vector<1x16x128xf32>
    tpu.vector_store %arg8[%c0_9, %c0_10, %c0_11], %13 {strides = array<i32>} : memref<2x16x128xf32, #tpu.memory_space<vmem>>, vector<1x16x128xf32>,
    %c0_12 = arith.constant 0 : index
    %c0_13 = arith.constant 0 : index
    %c0_14 = arith.constant 0 : index
    %14 = vector.load %arg9[%c0_12, %c0_13, %c0_14] : memref<2x16x1xf32, #tpu.memory_space<vmem>>, vector<1x16x1xf32>
    %15 = vector.shape_cast %14 : vector<1x16x1xf32> to vector<16x1xf32>
    %cst_15 = arith.constant dense<0.000000e+00> : vector<16xf32>
    %16 = vector.multi_reduction <add>, %4, %cst_15 [1] : vector<16x16xf32> to vector<16xf32>
    %17 = vector.shape_cast %16 : vector<16xf32> to vector<16x1xf32>
    %18 = arith.addf %15, %17 : vector<16x1xf32>
    %c0_16 = arith.constant 0 : index
    %c0_17 = arith.constant 0 : index
    %c0_18 = arith.constant 0 : index
    %19 = vector.load %arg9[%c0_16, %c0_17, %c0_18] : memref<2x16x1xf32, #tpu.memory_space<vmem>>, vector<1x16x1xf32>
    %20 = vector.shape_cast %19 : vector<1x16x1xf32> to vector<16x1xf32>
    %21 = vector.shape_cast %18 : vector<16x1xf32> to vector<1x16x1xf32>
    tpu.vector_store %arg9[%c0_16, %c0_17, %c0_18], %21 {strides = array<i32>} : memref<2x16x1xf32, #tpu.memory_space<vmem>>, vector<1x16x1xf32>,
    %c1 = arith.constant 1 : index
    %c0_19 = arith.constant 0 : index
    %c0_20 = arith.constant 0 : index
    %22 = vector.load %arg4[%c1, %c0_19, %c0_20] : memref<2x16x16xf32, #tpu.memory_space<vmem>>, vector<1x16x16xf32>
    %23 = vector.shape_cast %22 : vector<1x16x16xf32> to vector<16x16xf32>
    %c1_21 = arith.constant 1 : index
    %c0_22 = arith.constant 0 : index
    %c0_23 = arith.constant 0 : index
    %24 = vector.load %arg8[%c1_21, %c0_22, %c0_23] : memref<2x16x128xf32, #tpu.memory_space<vmem>>, vector<1x16x128xf32>
    %25 = vector.shape_cast %24 : vector<1x16x128xf32> to vector<16x128xf32>
    %c1_24 = arith.constant 1 : index
    %c0_25 = arith.constant 0 : index
    %c0_26 = arith.constant 0 : index
    %26 = vector.load %arg3[%c1_24, %c0_25, %c0_26] : memref<2x16x128xf32, #tpu.memory_space<vmem>>, vector<1x16x128xf32>
    %27 = vector.shape_cast %26 : vector<1x16x128xf32> to vector<16x128xf32>
    %cst_27 = arith.constant dense<0.000000e+00> : vector<16x128xf32>
    %28 = tpu.matmul %23, %27, %cst_27 {dimension_numbers = #tpu.dot_dimension_numbers<[1], [0], [0], [1], [0, 0, 1, 1], [], []>} : vector<16x16xf32>, vector<16x128xf32>, vector<16x128xf32> -> vector<16x128xf32>
    %29 = arith.addf %25, %28 : vector<16x128xf32>
    %c1_28 = arith.constant 1 : index
    %c0_29 = arith.constant 0 : index
    %c0_30 = arith.constant 0 : index
    %30 = vector.load %arg8[%c1_28, %c0_29, %c0_30] : memref<2x16x128xf32, #tpu.memory_space<vmem>>, vector<1x16x128xf32>
    %31 = vector.shape_cast %30 : vector<1x16x128xf32> to vector<16x128xf32>
    %32 = vector.shape_cast %29 : vector<16x128xf32> to vector<1x16x128xf32>
    tpu.vector_store %arg8[%c1_28, %c0_29, %c0_30], %32 {strides = array<i32>} : memref<2x16x128xf32, #tpu.memory_space<vmem>>, vector<1x16x128xf32>,
    %c1_31 = arith.constant 1 : index
    %c0_32 = arith.constant 0 : index
    %c0_33 = arith.constant 0 : index
    %33 = vector.load %arg9[%c1_31, %c0_32, %c0_33] : memref<2x16x1xf32, #tpu.memory_space<vmem>>, vector<1x16x1xf32>
    %34 = vector.shape_cast %33 : vector<1x16x1xf32> to vector<16x1xf32>
    %cst_34 = arith.constant dense<0.000000e+00> : vector<16xf32>
    %35 = vector.multi_reduction <add>, %23, %cst_34 [1] : vector<16x16xf32> to vector<16xf32>
    %36 = vector.shape_cast %35 : vector<16xf32> to vector<16x1xf32>
    %37 = arith.addf %34, %36 : vector<16x1xf32>
    %c1_35 = arith.constant 1 : index
    %c0_36 = arith.constant 0 : index
    %c0_37 = arith.constant 0 : index
    %38 = vector.load %arg9[%c1_35, %c0_36, %c0_37] : memref<2x16x1xf32, #tpu.memory_space<vmem>>, vector<1x16x1xf32>
    %39 = vector.shape_cast %38 : vector<1x16x1xf32> to vector<16x1xf32>
    %40 = vector.shape_cast %37 : vector<16x1xf32> to vector<1x16x1xf32>
    tpu.vector_store %arg9[%c1_35, %c0_36, %c0_37], %40 {strides = array<i32>} : memref<2x16x1xf32, #tpu.memory_space<vmem>>, vector<1x16x1xf32>,
    %c0_i32_38 = arith.constant 0 : i32
    %41 = arith.cmpi eq, %arg2, %c0_i32_38 : i32
    %42 = arith.extui %41 : i1 to i32
    %c0_i32_39 = arith.constant 0 : i32
    %43 = arith.cmpi ne, %42, %c0_i32_39 : i32
    scf.if %43 {
      %c0_40 = arith.constant 0 : index
      %c0_41 = arith.constant 0 : index
      %44 = vector.load %arg5[%c0_40, %c0_41] : memref<128x128xf32, #tpu.memory_space<vmem>>, vector<128x128xf32>
      %c0_42 = arith.constant 0 : index
      %c0_43 = arith.constant 0 : index
      %45 = vector.load %arg6[%c0_42, %c0_43] : memref<1x128xf32, #tpu.memory_space<vmem>>, vector<1x128xf32>
      %c0_44 = arith.constant 0 : index
      %c0_45 = arith.constant 0 : index
      %c0_46 = arith.constant 0 : index
      %46 = vector.load %arg8[%c0_44, %c0_45, %c0_46] : memref<2x16x128xf32, #tpu.memory_space<vmem>>, vector<1x16x128xf32>
      %47 = vector.shape_cast %46 : vector<1x16x128xf32> to vector<16x128xf32>
      %cst_47 = arith.constant dense<0.000000e+00> : vector<16x128xf32>
      %48 = tpu.matmul %47, %44, %cst_47 {dimension_numbers = #tpu.dot_dimension_numbers<[1], [0], [0], [1], [0, 0, 1, 1], [], []>} : vector<16x128xf32>, vector<128x128xf32>, vector<16x128xf32> -> vector<16x128xf32>
      %c0_48 = arith.constant 0 : index
      %c0_49 = arith.constant 0 : index
      %c0_50 = arith.constant 0 : index
      %49 = vector.load %arg9[%c0_48, %c0_49, %c0_50] : memref<2x16x1xf32, #tpu.memory_space<vmem>>, vector<1x16x1xf32>
      %50 = vector.shape_cast %49 : vector<1x16x1xf32> to vector<16x1xf32>
      %cst_51 = arith.constant 1.000000e+00 : f32
      %51 = vector.broadcast %cst_51 : f32 to vector<16x1xf32>
      %52 = arith.addf %50, %51 : vector<16x1xf32>
      %53 = tpu.reciprocal %52 : vector<16x1xf32> -> vector<16x1xf32>
      %54 = vector.broadcast %53 : vector<16x1xf32> to vector<16x128xf32>
      %55 = arith.mulf %48, %54 : vector<16x128xf32>
      %56 = vector.broadcast %45 : vector<1x128xf32> to vector<16x128xf32>
      %57 = arith.addf %55, %56 : vector<16x128xf32>
      %c0_52 = arith.constant 0 : index
      %c0_53 = arith.constant 0 : index
      %c0_54 = arith.constant 0 : index
      %58 = vector.load %arg7[%c0_52, %c0_53, %c0_54] : memref<2x16x128xf32, #tpu.memory_space<vmem>>, vector<1x16x128xf32>
      %59 = vector.shape_cast %58 : vector<1x16x128xf32> to vector<16x128xf32>
      %60 = vector.shape_cast %57 : vector<16x128xf32> to vector<1x16x128xf32>
      tpu.vector_store %arg7[%c0_52, %c0_53, %c0_54], %60 {strides = array<i32>} : memref<2x16x128xf32, #tpu.memory_space<vmem>>, vector<1x16x128xf32>,
      %c1_55 = arith.constant 1 : index
      %c0_56 = arith.constant 0 : index
      %c0_57 = arith.constant 0 : index
      %61 = vector.load %arg8[%c1_55, %c0_56, %c0_57] : memref<2x16x128xf32, #tpu.memory_space<vmem>>, vector<1x16x128xf32>
      %62 = vector.shape_cast %61 : vector<1x16x128xf32> to vector<16x128xf32>
      %cst_58 = arith.constant dense<0.000000e+00> : vector<16x128xf32>
      %63 = tpu.matmul %62, %44, %cst_58 {dimension_numbers = #tpu.dot_dimension_numbers<[1], [0], [0], [1], [0, 0, 1, 1], [], []>} : vector<16x128xf32>, vector<128x128xf32>, vector<16x128xf32> -> vector<16x128xf32>
      %c1_59 = arith.constant 1 : index
      %c0_60 = arith.constant 0 : index
      %c0_61 = arith.constant 0 : index
      %64 = vector.load %arg9[%c1_59, %c0_60, %c0_61] : memref<2x16x1xf32, #tpu.memory_space<vmem>>, vector<1x16x1xf32>
      %65 = vector.shape_cast %64 : vector<1x16x1xf32> to vector<16x1xf32>
      %cst_62 = arith.constant 1.000000e+00 : f32
      %66 = vector.broadcast %cst_62 : f32 to vector<16x1xf32>
      %67 = arith.addf %65, %66 : vector<16x1xf32>
      %68 = tpu.reciprocal %67 : vector<16x1xf32> -> vector<16x1xf32>
      %69 = vector.broadcast %68 : vector<16x1xf32> to vector<16x128xf32>
      %70 = arith.mulf %63, %69 : vector<16x128xf32>
      %71 = vector.broadcast %45 : vector<1x128xf32> to vector<16x128xf32>
      %72 = arith.addf %70, %71 : vector<16x128xf32>
      %c1_63 = arith.constant 1 : index
      %c0_64 = arith.constant 0 : index
      %c0_65 = arith.constant 0 : index
      %73 = vector.load %arg7[%c1_63, %c0_64, %c0_65] : memref<2x16x128xf32, #tpu.memory_space<vmem>>, vector<1x16x128xf32>
      %74 = vector.shape_cast %73 : vector<1x16x128xf32> to vector<16x128xf32>
      %75 = vector.shape_cast %72 : vector<16x128xf32> to vector<1x16x128xf32>
      tpu.vector_store %arg7[%c1_63, %c0_64, %c0_65], %75 {strides = array<i32>} : memref<2x16x128xf32, #tpu.memory_space<vmem>>, vector<1x16x128xf32>,
    } else {
    }
    return
  }
  func.func @transform_0(%arg0: i32, %arg1: i32, %arg2: i32) -> (i32, i32, i32) {
    %c0_i32 = arith.constant 0 : i32
    %c0_i32_0 = arith.constant 0 : i32
    return %arg0, %arg2, %c0_i32 : i32, i32, i32
  }
  func.func @transform_1(%arg0: i32, %arg1: i32, %arg2: i32) -> (i32, i32, i32) {
    %c0_i32 = arith.constant 0 : i32
    return %arg0, %arg1, %arg2 : i32, i32, i32
  }
  func.func @transform_2(%arg0: i32, %arg1: i32, %arg2: i32) -> (i32, i32) {
    %c0_i32 = arith.constant 0 : i32
    %c0_i32_0 = arith.constant 0 : i32
    %c0_i32_1 = arith.constant 0 : i32
    return %c0_i32, %c0_i32_0 : i32, i32
  }
  func.func @transform_3(%arg0: i32, %arg1: i32, %arg2: i32) -> (i32, i32) {
    %c0_i32 = arith.constant 0 : i32
    %c0_i32_0 = arith.constant 0 : i32
    %c0_i32_1 = arith.constant 0 : i32
    return %c0_i32, %c0_i32_0 : i32, i32
  }
  func.func @transform_4(%arg0: i32, %arg1: i32, %arg2: i32) -> (i32, i32, i32) {
    %c0_i32 = arith.constant 0 : i32
    %c0_i32_0 = arith.constant 0 : i32
    return %arg0, %arg1, %c0_i32 : i32, i32, i32
  }
}

</mosaic_0001>

<bundles_post_ra>
// kernel: tpu_custom_call.1
= control target key start
LH: loop header
LB: loop body
LE: loop exit
PB: predicated region body
PF: predicated region fallthrough
CT: control target
= control target key end

     0   :  { %9 = vsyncpa [#allocation5], 0  ;;  %s840_s0 = inlined_call_operand.hbm [shape: f32[2,16,128], index: 0, kind: input, shape index: {}]   ;;  %s841_s1 = inlined_call_operand.hbm [shape: f32[2,16,16], index: 1, kind: input, shape index: {}]   ;;  %s842_s2 = inlined_call_operand.hbm [shape: f32[128,128], index: 2, kind: input, shape index: {}]   ;;  %s843_s3 = inlined_call_operand.vmem [shape: f32[1,128], index: 3, kind: input, shape index: {}]   ;;  %s844_s4 = inlined_call_operand.hbm [shape: f32[2,16,128], index: 4, kind: output, shape index: {}]  }
   0x1   :  { %10 = vsyncpa [#allocation8], 0 }
   0x2   :  { %11 = vsyncpa [#allocation6], 0  ;;  %s764_s15 = smov [#allocation7]   ;;  %s765_s17 = smov [#allocation4]  }
   0x3   :  { %s29_s16 = sshll.u32 %s764_s15, 4  ;;  %s17_s18 = sshll.u32 %s765_s17, 4  ;;  %s30_s16 = int_to_ptr.vmem [resolvable:$true] %s29_s16  ;;  %s18_s18 = int_to_ptr.vmem [resolvable:$true] %s17_s18 }
   0x4   :  { %s686_s19 = scalar_lea.vmem %s30_s16, 512  ;;  %p691_p1 = scmp.lt.s32.totalorder %s30_s16, %s30_s16 }
   0x5   :  { %p687_p0 = scmp.ne.s32.totalorder %s30_s16, %s686_s19  ;;  %p692_p2 = scmp.lt.s32.totalorder %s686_s19, %s686_s19 }
   0x7   :  { %p693_p3 = por %p692_p2, %p691_p1 }
   0x9   :  { %p694_p4 = pnand %p693_p3, %p687_p0 }
   0xb   :  { %697 = shalt.err (!%p694_p4)
}
   0xc   :  { %s766_s20 = smov 128   ;;  %s767_s21 = smov 8  }
   0xd   :  { %35 = dma.hbm_to_vmem [thread:$0]  %s841_s1, 512, %s30_s16, [#allocation8], %s766_s20, %s766_s20, %s767_s21  }
   0xe   :  { %s706_s24 = scalar_lea.vmem %s18_s18, 512  ;;  %p711_p6 = scmp.lt.s32.totalorder %s18_s18, %s18_s18 }
   0xf   :  { %p707_p5 = scmp.ne.s32.totalorder %s18_s18, %s706_s24  ;;  %p712_p7 = scmp.lt.s32.totalorder %s706_s24, %s706_s24 }
  0x11   :  { %p713_p8 = por %p712_p7, %p711_p6 }
  0x13   :  { %p714_p9 = pnand %p713_p8, %p707_p5 }
  0x15   :  { %717 = shalt.err (!%p714_p9)
}
  0x16   :  { %23 = dma.hbm_to_vmem [thread:$0]  %s840_s0, 512, %s18_s18, [#allocation5], %s766_s20, %s766_s20, %s767_s21  }
  0x17   :  { %s768_s27 = smov [#allocation9]  }
  0x18   :  { %s41_s28 = sshll.u32 %s768_s27, 4  ;;  %s42_s28 = int_to_ptr.vmem [resolvable:$true] %s41_s28 }
  0x19   :  { %s726_s29 = scalar_lea.vmem %s42_s28, 2048  ;;  %p731_p11 = scmp.lt.s32.totalorder %s42_s28, %s42_s28 }
  0x1a   :  { %p727_p10 = scmp.ne.s32.totalorder %s42_s28, %s726_s29  ;;  %p732_p12 = scmp.lt.s32.totalorder %s726_s29, %s726_s29 }
  0x1c   :  { %p733_p13 = por %p732_p12, %p731_p11 }
  0x1e   :  { %p734_p0 = pnand %p733_p13, %p727_p10 }
  0x20   :  { %737 = shalt.err (!%p734_p0)
}
  0x21   :  { %47 = dma.hbm_to_vmem [thread:$0]  %s842_s2, 2048, %s42_s28, [#allocation8], %s766_s20, %s766_s20, %s767_s21  }
  0x22   :  { %758 = dma.done.wait [#allocation5], 512  }
  0x23   :  { %759 = vsyncadd [#allocation5], 4294966784 }
  0x24   :  { %760 = dma.done.wait [#allocation8], 2560  }
  0x25   :  { %761 = vsyncadd [#allocation8], 4294964736  ;;  %v77_v0 = vld [vmem:[#allocation4 + $0x8] sm:$0xff]  ;;  %v185_v1 = vld [vmem:[#allocation4 + $0x18] sm:$0xff]  ;;  %vm78_vm0 = vcmask 130048   ;;  %vm67_vm1 = vcmask 7168  }
  0x26   :  { %v76_v2 = vld [vmem:[#allocation4] sm:$0xff]  ;;  %576 = vmatprep.subr.mxu0 %v77_v0  ;;  %583 = vmatprep.subr.mxu1 %v185_v1  ;;  %v184_v3 = vld [vmem:[#allocation4 + $0x10] sm:$0xff]  ;;  %v73_v6 = vld [vmem:[#allocation7 + $0x8] sm:$0xff]  ;;  %v769_v28 = vmov 0.0   ;;  %v770_v29 = vmov 0   ;;  %s771_s5 = smov [#allocation10]  }
  0x27   :  { %v72_v4 = vld [vmem:[#allocation7] sm:$0xff]  ;;  %577 = vmatpush3.msra.mxu0 %v77_v0  ;;  %584 = vmatpush3.msra.mxu1 %v185_v1  ;;  %v178_v5 = vld [vmem:[#allocation7 + $0x10] sm:$0xff]  ;;  %v179_v7 = vld [vmem:[#allocation7 + $0x18] sm:$0xff]  ;;  %v169_v12 = vsel %vm78_vm0, %v73_v6, 0.0  ;;  %68 = vst.msk [vmem:[#allocation3] sm:$0xff] %vm67_vm1, %v769_v28  ;;  %s514_s6 = sshll.u32 %s771_s5, 4  ;;  %s515_s6 = int_to_ptr.vmem [resolvable:$true] %s514_s6 }
  0x28   :  { %578 = vmatprep.subr.mxu0 %v76_v2  ;;  %585 = vmatprep.subr.mxu1 %v184_v3  ;;  %v166_v8 = vsel %vm78_vm0, %v72_v4, 0.0  ;;  %v274_v9 = vsel %vm78_vm0, %v178_v5, 0.0  ;;  %v302_v10 = vld [vmem:[#allocation9 + $0x78] sm:$0xff]  ;;  %v301_v11 = vld [vmem:[#allocation9 + $0x70] sm:$0xff]  ;;  %v277_v13 = vsel %vm78_vm0, %v179_v7, 0.0  ;;  %v300_v14 = vld [vmem:[#allocation9 + $0x68] sm:$0xff]  ;;  %p743_p2 = scmp.lt.s32.totalorder %s515_s6, %s515_s6 }
  0x29   :  { %579 = vmatpush3.msra.mxu0 %v76_v2  ;;  %580 = vmatprep.mubr.msk.f32.mxu0 %vm78_vm0, %v72_v4  ;;  %v299_v15 = vld [vmem:[#allocation9 + $0x60] sm:$0xff]  ;;  %v298_v16 = vld [vmem:[#allocation9 + $0x58] sm:$0xff]  ;;  %v297_v17 = vld [vmem:[#allocation9 + $0x50] sm:$0xff]  ;;  %69 = vst.msk [vmem:[#allocation3 + $0x8] sm:$0xff] %vm67_vm1, %v769_v28 }
  0x2a   :  { %586 = vmatpush3.msra.mxu1 %v184_v3  ;;  %587 = vmatprep.mubr.msk.f32.mxu1 %vm78_vm0, %v178_v5  ;;  %v296_v18 = vld [vmem:[#allocation9 + $0x48] sm:$0xff]  ;;  %v295_v19 = vld [vmem:[#allocation9 + $0x40] sm:$0xff]  ;;  %v294_v20 = vld [vmem:[#allocation9 + $0x38] sm:$0xff]  ;;  %70 = vst.msk [vmem:[#allocation3 + $0x10] sm:$0xff] %vm67_vm1, %v769_v28 }
  0x2b   :  { %581 = vmatmul.mubr.msk.f32.vlgmr.msra.gmra.mxu0 %vm78_vm0, %v73_v6  ;;  %588 = vmatmul.mubr.msk.f32.vlgmr.msra.gmra.mxu1 %vm78_vm0, %v179_v7  ;;  %v293_v21 = vld [vmem:[#allocation9 + $0x30] sm:$0xff]  ;;  %v292_v22 = vld [vmem:[#allocation9 + $0x28] sm:$0xff]  ;;  %v291_v23 = vld [vmem:[#allocation9 + $0x20] sm:$0xff]  ;;  %71 = vst.msk [vmem:[#allocation3 + $0x18] sm:$0xff] %vm67_vm1, %v769_v28 }
  0x2c   :  { %167 = vadd.xlane.f32.xlu0 %v166_v8  ;;  %275 = vadd.xlane.f32.xlu1 %v274_v9  ;;  %v290_v24 = vld [vmem:[#allocation9 + $0x18] sm:$0xff]  ;;  %v289_v25 = vld [vmem:[#allocation9 + $0x10] sm:$0xff]  ;;  %v288_v26 = vld [vmem:[#allocation9 + $0x8] sm:$0xff] }
  0x2d   :  { %590 = vmatprep.subr.mxu0 %v302_v10  ;;  %625 = vmatprep.subr.mxu1 %v302_v10  ;;  %v287_v27 = vld [vmem:[#allocation9] sm:$0xff] }
  0x2e   :  { %591 = vmatpush3.msra.mxu0 %v302_v10  ;;  %626 = vmatpush3.msra.mxu1 %v302_v10  ;;  %v164_v30 = vld [vmem:[#allocation3] sm:$0xff] }
  0x2f   :  { %592 = vmatprep.subr.mxu0 %v301_v11  ;;  %627 = vmatprep.subr.mxu1 %v301_v11  ;;  %v531_v61 = vld [vmem:[%s843_s3] ss:$0 sm:$0xff]  ;;  %s738_s3 = scalar_lea.vmem %s515_s6, 512 }
  0x30   :  { %170 = vadd.xlane.f32.xlu0 %v169_v12  ;;  %278 = vadd.xlane.f32.xlu1 %v277_v13  ;;  %v165_v36 = vld [vmem:[#allocation3 + $0x8] sm:$0xff]  ;;  %p739_p1 = scmp.ne.s32.totalorder %s515_s6, %s738_s3  ;;  %p744_p3 = scmp.lt.s32.totalorder %s738_s3, %s738_s3 }
  0x31   :  { %593 = vmatpush3.msra.mxu0 %v301_v11  ;;  %628 = vmatpush3.msra.mxu1 %v301_v11  ;;  %v272_v31 = vld [vmem:[#allocation3 + $0x10] sm:$0xff] }
  0x32   :  { %594 = vmatprep.subr.mxu0 %v300_v14  ;;  %629 = vmatprep.subr.mxu1 %v300_v14  ;;  %v273_v37 = vld [vmem:[#allocation3 + $0x18] sm:$0xff]  ;;  %p745_p4 = por %p744_p3, %p743_p2 }
  0x33   :  { %595 = vmatpush3.msra.mxu0 %v300_v14  ;;  %630 = vmatpush3.msra.mxu1 %v300_v14 }
  0x34   :  { %596 = vmatprep.subr.mxu0 %v299_v15  ;;  %631 = vmatprep.subr.mxu1 %v299_v15  ;;  %p746_p5 = pnand %p745_p4, %p739_p1 }
  0x35   :  { %597 = vmatpush3.msra.mxu0 %v299_v15  ;;  %632 = vmatpush3.msra.mxu1 %v299_v15 }
  0x36   :  { %598 = vmatprep.subr.mxu0 %v298_v16  ;;  %633 = vmatprep.subr.mxu1 %v298_v16 }
  0x37   :  { %599 = vmatpush3.msra.mxu0 %v298_v16  ;;  %634 = vmatpush3.msra.mxu1 %v298_v16 }
  0x38   :  { %600 = vmatprep.subr.mxu0 %v297_v17  ;;  %635 = vmatprep.subr.mxu1 %v297_v17 }
  0x39   :  { %601 = vmatpush3.msra.mxu0 %v297_v17  ;;  %636 = vmatpush3.msra.mxu1 %v297_v17 }
  0x3a   :  { %602 = vmatprep.subr.mxu0 %v296_v18  ;;  %637 = vmatprep.subr.mxu1 %v296_v18 }
  0x3b   :  { %603 = vmatpush3.msra.mxu0 %v296_v18  ;;  %638 = vmatpush3.msra.mxu1 %v296_v18 }
  0x3c   :  { %604 = vmatprep.subr.mxu0 %v295_v19  ;;  %639 = vmatprep.subr.mxu1 %v295_v19 }
  0x3d   :  { %605 = vmatpush3.msra.mxu0 %v295_v19  ;;  %640 = vmatpush3.msra.mxu1 %v295_v19 }
  0x3e   :  { %606 = vmatprep.subr.mxu0 %v294_v20  ;;  %641 = vmatprep.subr.mxu1 %v294_v20 }
  0x3f   :  { %607 = vmatpush3.msra.mxu0 %v294_v20  ;;  %642 = vmatpush3.msra.mxu1 %v294_v20 }
  0x40   :  { %608 = vmatprep.subr.mxu0 %v293_v21  ;;  %643 = vmatprep.subr.mxu1 %v293_v21 }
  0x41   :  { %609 = vmatpush3.msra.mxu0 %v293_v21  ;;  %644 = vmatpush3.msra.mxu1 %v293_v21 }
  0x42   :  { %610 = vmatprep.subr.mxu0 %v292_v22  ;;  %645 = vmatprep.subr.mxu1 %v292_v22 }
  0x43   :  { %611 = vmatpush3.msra.mxu0 %v292_v22  ;;  %646 = vmatpush3.msra.mxu1 %v292_v22 }
  0x44   :  { %612 = vmatprep.subr.mxu0 %v291_v23  ;;  %647 = vmatprep.subr.mxu1 %v291_v23 }
  0x45   :  { %613 = vmatpush3.msra.mxu0 %v291_v23  ;;  %648 = vmatpush3.msra.mxu1 %v291_v23 }
  0x46   :  { %614 = vmatprep.subr.mxu0 %v290_v24  ;;  %649 = vmatprep.subr.mxu1 %v290_v24 }
  0x47   :  { %615 = vmatpush3.msra.mxu0 %v290_v24  ;;  %650 = vmatpush3.msra.mxu1 %v290_v24 }
  0x48   :  { %616 = vmatprep.subr.mxu0 %v289_v25  ;;  %651 = vmatprep.subr.mxu1 %v289_v25 }
  0x49   :  { %617 = vmatpush3.msra.mxu0 %v289_v25  ;;  %652 = vmatpush3.msra.mxu1 %v289_v25 }
  0x4a   :  { %618 = vmatprep.subr.mxu0 %v288_v26  ;;  %653 = vmatprep.subr.mxu1 %v288_v26 }
  0x4b   :  { %619 = vmatpush3.msra.mxu0 %v288_v26  ;;  %654 = vmatpush3.msra.mxu1 %v288_v26 }
  0x4c   :  { %620 = vmatprep.subr.mxu0 %v287_v27  ;;  %655 = vmatprep.subr.mxu1 %v287_v27 }
  0x4d   :  { %621 = vmatpush3.msra.mxu0 %v287_v27  ;;  %656 = vmatpush3.msra.mxu1 %v287_v27 }
  0x4e   :  { %669 = vset.pattern.permute.xlu1 %v770_v29  ;;  %668 = vset.pattern.permute.xlu0 %v770_v29 }
  0xb5   :  { %v168_v32 = vpop.xlane.xlu0 %167  ;;  %v276_v33 = vpop.xlane.xlu1 %275 }
  0xb6   :  { %v172_v34 = vadd.f32 %v168_v32, %v164_v30  ;;  %v280_v35 = vadd.f32 %v276_v33, %v272_v31 }
  0xb8   :  { %175 = vst.msk [vmem:[#allocation3] sm:$0xff] %vm67_vm1, %v172_v34  ;;  %282 = vst.msk [vmem:[#allocation3 + $0x10] sm:$0xff] %vm67_vm1, %v280_v35 }
  0xb9   :  { %v171_v38 = vpop.xlane.xlu0 %170  ;;  %v279_v39 = vpop.xlane.xlu1 %278 }
  0xba   :  { %v173_v40 = vadd.f32 %v171_v38, %v165_v36  ;;  %v281_v41 = vadd.f32 %v279_v39, %v273_v37 }
  0xbc   :  { %176 = vst.msk [vmem:[#allocation3 + $0x8] sm:$0xff] %vm67_vm1, %v173_v40  ;;  %283 = vst.msk [vmem:[#allocation3 + $0x18] sm:$0xff] %vm67_vm1, %v281_v41 }
  0xbf   :  { %v381_v42 = vld [vmem:[#allocation3] sm:$0xff]  ;;  %v486_v44 = vld [vmem:[#allocation3 + $0x10] sm:$0xff] }
  0xc0   :  { %v383_v43 = vadd.f32 1.0, %v381_v42  ;;  %v488_v47 = vadd.f32 1.0, %v486_v44 }
  0xc2   :  { %670 = vrcp.f32 %v383_v43 }
  0xc3   :  { %v382_v45 = vld [vmem:[#allocation3 + $0x8] sm:$0xff]  ;;  %v487_v48 = vld [vmem:[#allocation3 + $0x18] sm:$0xff] }
  0xc4   :  { %v384_v46 = vadd.f32 1.0, %v382_v45  ;;  %v489_v49 = vadd.f32 1.0, %v487_v48 }
  0xc6   :  { %672 = vrcp.f32 %v384_v46 }
  0xc7   :  { %674 = vrcp.f32 %v488_v47 }
  0xc8   :  { %676 = vrcp.f32 %v489_v49 }
  0xcf   :  { %v671_v50 = vpop.eup %670 }
  0xd0   :  { %389 = vperm.xlu0 %668, %v671_v50  }
  0xd3   :  { %v673_v51 = vpop.eup %672 }
  0xd4   :  { %394 = vperm.xlu1 %669, %v673_v51   ;;  %v675_v52 = vpop.eup %674 }
  0xd5   :  { %v677_v53 = vpop.eup %676 }
  0xd8   :  { %494 = vperm.xlu1 %669, %v675_v52  }
  0xdc   :  { %499 = vperm.xlu1 %669, %v677_v53  }
  0xeb   :  { %v582_v54 = vpop.f32.mrf.mxu0  ;;  %v589_v55 = vpop.f32.mrf.mxu1 }
  0xed   :  { %v151_v56 = vpop.f32.mrf.mxu0  ;;  %v258_v57 = vpop.f32.mrf.mxu1 }
  0xee   :  { %622 = vmatprep.mubr.f32.mxu0 %v151_v56  ;;  %657 = vmatprep.mubr.f32.mxu1 %v258_v57 }
  0xef   :  { %623 = vmatmul.mubr.f32.vlgmr.msra.gmra.mxu0 %v582_v54  ;;  %658 = vmatmul.mubr.f32.vlgmr.msra.gmra.mxu1 %v589_v55 }
 0x14b   :  { %v390_v0 = vpop.permute.xlu0 %389 }
 0x14f   :  { %v395_v58 = vpop.permute.xlu1 %394 }
 0x153   :  { %v495_v59 = vpop.permute.xlu1 %494 }
 0x157   :  { %v500_v60 = vpop.permute.xlu1 %499 }
 0x1af   :  { %v624_v62 = vpop.f32.mrf.mxu0  ;;  %v659_v63 = vpop.f32.mrf.mxu1 }
 0x1b0   :  { %v398_v1 = vmul.f32 %v624_v62, %v395_v58  ;;  %v503_v2 = vmul.f32 %v659_v63, %v500_v60 }
 0x1b1   :  { %v372_v3 = vpop.f32.mrf.mxu0  ;;  %v477_v4 = vpop.f32.mrf.mxu1 }
 0x1b2   :  { %v406_v5 = vadd.f32 %v531_v61, %v398_v1  ;;  %v505_v6 = vadd.f32 %v531_v61, %v503_v2  ;;  %v397_v7 = vmul.f32 %v390_v0, %v372_v3  ;;  %v502_v8 = vmul.f32 %v495_v59, %v477_v4 }
 0x1b4   :  { %408 = vst [vmem:[#allocation10 + $0x8] sm:$0xff] %v406_v5  ;;  %508 = vst [vmem:[#allocation10 + $0x18] sm:$0xff] %v505_v6  ;;  %v405_v9 = vadd.f32 %v531_v61, %v397_v7  ;;  %v504_v10 = vadd.f32 %v531_v61, %v502_v8 }
 0x1b6   :  { %407 = vst [vmem:[#allocation10] sm:$0xff] %v405_v9  ;;  %507 = vst [vmem:[#allocation10 + $0x10] sm:$0xff] %v504_v10 }
 0x1b7   :  { %749 = shalt.err (!%p746_p5)
}
 0x1b8   :  { %520 = dma.vmem_to_hbm [thread:$0]  %s515_s6, 512, %s844_s4, [#allocation6], %s766_s20, %s766_s20, %s767_s21  }
 0x1b9   :  { %762 = dma.done.wait [#allocation6], 512  }
 0x1ba   :  { %763 = vsyncadd [#allocation6], 4294966784 }
 0x1bb   :  { %524 = vsyncpa [#allocation5], 1 }
 0x1bc   :  { %525 = vsyncpa [#allocation8], 1 }
 0x1bd   :  { %526 = vsyncpa [#allocation6], 1 }

</bundles_post_ra>
